<compile_context>
chip_gen: v6e
topology: v6e:2x2x1
jax: 0.10.0
libtpu: 0.0.40
codegen_flags: <defaults>
</compile_context>

<pallas_src>
import math

import jax
import jax.numpy as jnp
from jax import lax
from jax.experimental import pallas as pl
from jax.experimental.pallas import tpu as pltpu


def _psg_linear_kernel(x_ref, w_ref, b_ref, o_ref):
    # x_ref: (block_b, 1, IN)            sample-major activations (f32)
    # w_ref: (block_b, block_out, IN)    per-sample weights, NATIVE (OUT, IN) layout
    # b_ref: (block_b, 1, block_out)     per-sample bias
    # o_ref: (block_b, 1, block_out)     per-sample output
    block_b = o_ref.shape[0]
    unroll = math.gcd(block_b, 8)        # always divides block_b exactly

    def body(t, carry):
        base = t * unroll
        for u in range(unroll):          # partial unroll inside the fori body
            s = base + u
            xs = x_ref[s]                                  # (1, IN)
            ws = w_ref[s].astype(xs.dtype)                 # (block_out, IN); upcast if bf16
            # Contract IN (last dim of both): y = x @ W^T, f32 accumulation on MXU.
            ys = lax.dot_general(
                xs, ws,
                dimension_numbers=(((1,), (1,)), ((), ())),
                preferred_element_type=jnp.float32)        # (1, block_out)
            o_ref[s] = (ys + b_ref[s].astype(jnp.float32)).astype(o_ref.dtype)
        return carry

    lax.fori_loop(0, block_b // unroll, body, 0)


def _vmem_capacity_bytes():
    try:
        return int(pltpu.get_tpu_info().vmem_capacity_bytes)
    except Exception:
        return 64 * 1024 * 1024          # conservative fallback (v7x per-TC VMEM)


def psg_linear_forward(x, expanded_weight, expanded_bias=None, *, weight_dtype=None):
    """Per-sample linear: y[b] = W[b] @ x[b] + bias[b] for b < batch.

    x:               (B, in_features)               (f32)
    expanded_weight: (max_batch_size, out_features, in_features, 1)
    expanded_bias:   (max_batch_size, out_features) or None
    weight_dtype:    optional narrower dtype (e.g. jnp.bfloat16) for the weight
                     stream only; x / bias / out stay in x.dtype, accumulation f32.
    returns:         (B, out_features) in x.dtype
    """
    B, in_features = x.shape
    max_batch, out_features, in_w, k = expanded_weight.shape
    assert in_w == in_features and k == 1
    assert B <= max_batch, "batch exceeds max_batch_size"

    # Native layout: (MB, OUT, IN, 1) -> (MB, OUT, IN) is a free reshape of
    # contiguous data (no transpose, no extra HBM pass over the weights).
    w = expanded_weight.reshape(max_batch, out_features, in_features)
    if weight_dtype is not None:
        # Reduced-precision *weight* streaming only.
        # TODO(synk): int8 weights + per-channel scales on v5e/v6e (MXU int path)
        # and fp8-e4m3 on v7x would quarter the dominant HBM stream.
        w = w.astype(weight_dtype)
    if expanded_bias is None:
        expanded_bias = jnp.zeros((max_batch, out_features), x.dtype)

    w_item = jnp.dtype(w.dtype).itemsize
    x_item = jnp.dtype(x.dtype).itemsize
    b_item = jnp.dtype(expanded_bias.dtype).itemsize

    # ---- generation-aware VMEM budget (double-buffered tiles) ----
    vmem_cap = _vmem_capacity_bytes()                       # 64 MiB v7x, 128 MiB v5e/v6e
    vmem_limit = min(int(vmem_cap * 0.85), vmem_cap - (16 << 20))
    tile_budget = int(vmem_limit * 0.45)                    # one tile set; x2 for pipelining

    # ---- block_out: lane-dense; shrink in 128-multiples before starving block_b ----
    if out_features % 128 == 0:
        block_out = min(out_features, 1024)
    else:
        block_out = out_features                            # full OUT (layout constraint)

    def per_sample_bytes(bo):
        return (in_features * bo * w_item                   # weight slab (dense)
                + 8 * in_features * x_item                  # x row (8-sublane padded)
                + 8 * bo * b_item + 8 * bo * x_item)        # bias + out rows (padded)

    while (block_out > 128 and block_out % 128 == 0
           and per_sample_bytes(block_out) > tile_budget):
        block_out = max(128, (block_out // 256) * 128)
    # TODO(synk): if even block_out=128 with block_b=1 overflows the budget (huge
    # in_features), add an IN grid axis ("arbitrary") with an f32 VMEM accumulator
    # and pl.when init/finalize instead of spilling.

    # ---- block_b: fill the VMEM budget (no artificial cap) ----
    block_b = max(1, min(B, tile_budget // per_sample_bytes(block_out)))
    # v7x has 2 TensorCores: make sure the parallel grid has at least 2 blocks.
    if pl.cdiv(out_features, block_out) == 1 and B >= 2:
        block_b = min(block_b, pl.cdiv(B, 2))
    if block_b >= 8:
        block_b -= block_b % 8
    # Keep every weight / bias block window inside max_batch so edge blocks never
    # index past the parameter arrays.
    while block_b > 1 and pl.cdiv(B, block_b) * block_b > max_batch:
        block_b -= 1

    grid_b = pl.cdiv(B, block_b)
    grid_o = pl.cdiv(out_features, block_out)
    B_pad = grid_b * block_b                                 # <= max_batch by construction

    # Pad the (tiny) activation stream so every block is fully in bounds.
    if B_pad > B:
        x = jnp.pad(x, ((0, B_pad - B), (0, 0)))
    x3 = x[:, None, :]                                       # (B_pad, 1, IN) sample-major
    bias3 = expanded_bias[:, None, :]                        # (MB, 1, OUT)

    cost = pl.CostEstimate(
        flops=2 * B_pad * in_features * out_features,
        transcendentals=0,
        bytes_accessed=(B_pad * in_features * out_features * w_item
                        + B_pad * in_features * x_item
                        + B_pad * out_features * (b_item + x_item)),
    )

    out3 = pl.pallas_call(
        _psg_linear_kernel,
        out_shape=jax.ShapeDtypeStruct((B_pad, 1, out_features), x.dtype),
        grid=(grid_b, grid_o),
        in_specs=[
            pl.BlockSpec((block_b, 1, in_features), lambda b, o: (b, 0, 0)),
            pl.BlockSpec((block_b, block_out, in_features), lambda b, o: (b, o, 0)),
            pl.BlockSpec((block_b, 1, block_out), lambda b, o: (b, 0, o)),
        ],
        out_specs=pl.BlockSpec((block_b, 1, block_out), lambda b, o: (b, 0, o)),
        compiler_params=pltpu.CompilerParams(
            dimension_semantics=("parallel", "parallel"),
            vmem_limit_bytes=vmem_limit,
        ),
        cost_estimate=cost,
    )(x3, w, bias3)
    return out3[:B, 0, :]


def init_params(key, in_features, out_features, max_batch_size, dtype=jnp.float32):
    """Deterministic init matching Conv1d's kaiming-uniform fan-in bound.

    expanded_weight starts as `max_batch_size` identical copies (torch .expand),
    but semantically each sample owns its own slice, so we keep the full
    (max_batch_size, out, in, 1) tensor.
    """
    k_w, k_b = jax.random.split(key)
    bound = 1.0 / jnp.sqrt(jnp.float32(in_features))          # fan_in = in_features * 1
    base_w = jax.random.uniform(
        k_w, (out_features, in_features, 1), dtype, minval=-bound, maxval=bound)
    base_b = jax.random.uniform(
        k_b, (out_features,), dtype, minval=-bound, maxval=bound)
    expanded_weight = jnp.broadcast_to(
        base_w[None], (max_batch_size, out_features, in_features, 1))
    expanded_bias = jnp.broadcast_to(
        base_b[None], (max_batch_size, out_features))
    return expanded_weight, expanded_bias


if __name__ == "__main__":
    key = jax.random.PRNGKey(0)

    def check(batch, max_batch_size, in_features, out_features, key,
              weight_dtype=None, tol=1e-5):
        k_x, k_p = jax.random.split(key)
        x = jax.random.normal(k_x, (batch, in_features), jnp.float32)
        ew, eb = init_params(k_p, in_features, out_features, max_batch_size)
        y = jax.block_until_ready(
            psg_linear_forward(x, ew, eb, weight_dtype=weight_dtype))
        # reference: per-sample linear using the first `batch` weight slices
        y_ref = jnp.einsum("boi,bi->bo", ew[:batch, ..., 0], x) + eb[:batch]
        assert y.shape == (batch, out_features)
        assert jnp.allclose(y, y_ref, atol=tol, rtol=tol), (
            float(jnp.max(jnp.abs(y - y_ref))))

    k1, k2, k3 = jax.random.split(key, 3)
    # Small config consistent with the module defaults (exact f32 path).
    check(batch=2, max_batch_size=4, in_features=32, out_features=16, key=k1)
    # Batch blocking with an uneven edge block (grid_b >= 2, padded batch rows).
    check(batch=12, max_batch_size=16, in_features=32, out_features=16, key=k2)
    # Reduced-precision weight streaming: bf16 weights, f32 x / accumulate / out.
    check(batch=4, max_batch_size=8, in_features=128, out_features=128, key=k3,
          weight_dtype=jnp.bfloat16, tol=2e-2)

    print("KERNEL_OK")
</pallas_src>

<mosaic_0001>
module attributes {stable_mosaic.version = 11 : i64} {
  func.func @_psg_linear_kernel(%arg0: i32, %arg1: i32, %arg2: memref<1x1x32xf32, #tpu.memory_space<vmem>>, %arg3: memref<1x16x32xf32, #tpu.memory_space<vmem>>, %arg4: memref<1x1x16xf32, #tpu.memory_space<vmem>>, %arg5: memref<1x1x16xf32, #tpu.memory_space<vmem>>) attributes {dimension_semantics = [#tpu.dimension_semantics<parallel>, #tpu.dimension_semantics<parallel>], iteration_bounds = array<i64: 2, 1>, scalar_prefetch = 0 : i64, scratch_operands = 0 : i64, tpu.core_type = #tpu.core_type<tc>, window_params = [{transform_indices = @transform_0, window_bounds = array<i64: 1, 1, 32>}, {transform_indices = @transform_1, window_bounds = array<i64: 1, 16, 32>}, {transform_indices = @transform_2, window_bounds = array<i64: 1, 1, 16>}, {transform_indices = @transform_3, window_bounds = array<i64: 1, 1, 16>}]} {
    %c0_i32 = arith.constant 0 : i32
    %c1_i32 = arith.constant 1 : i32
    %0 = arith.muli %c0_i32, %c1_i32 : i32
    %c0_i32_0 = arith.constant 0 : i32
    %1 = arith.addi %0, %c0_i32_0 : i32
    %2 = arith.index_cast %1 : i32 to index
    %c0 = arith.constant 0 : index
    %c0_1 = arith.constant 0 : index
    %3 = vector.load %arg2[%2, %c0, %c0_1] : memref<1x1x32xf32, #tpu.memory_space<vmem>>, vector<1x1x32xf32>
    %4 = vector.shape_cast %3 : vector<1x1x32xf32> to vector<1x32xf32>
    %5 = arith.index_cast %1 : i32 to index
    %c0_2 = arith.constant 0 : index
    %c0_3 = arith.constant 0 : index
    %6 = vector.load %arg3[%5, %c0_2, %c0_3] : memref<1x16x32xf32, #tpu.memory_space<vmem>>, vector<1x16x32xf32>
    %7 = vector.shape_cast %6 : vector<1x16x32xf32> to vector<16x32xf32>
    %cst = arith.constant dense<0.000000e+00> : vector<1x16xf32>
    %8 = tpu.matmul %4, %7, %cst {dimension_numbers = #tpu.dot_dimension_numbers<[1], [1], [0], [0], [0, 0, 1, 0], [], []>} : vector<1x32xf32>, vector<16x32xf32>, vector<1x16xf32> -> vector<1x16xf32>
    %9 = arith.index_cast %1 : i32 to index
    %c0_4 = arith.constant 0 : index
    %c0_5 = arith.constant 0 : index
    %10 = vector.load %arg4[%9, %c0_4, %c0_5] : memref<1x1x16xf32, #tpu.memory_space<vmem>>, vector<1x1x16xf32>
    %11 = vector.shape_cast %10 : vector<1x1x16xf32> to vector<1x16xf32>
    %12 = arith.addf %8, %11 : vector<1x16xf32>
    %13 = arith.index_cast %1 : i32 to index
    %c0_6 = arith.constant 0 : index
    %c0_7 = arith.constant 0 : index
    %14 = vector.load %arg5[%13, %c0_6, %c0_7] : memref<1x1x16xf32, #tpu.memory_space<vmem>>, vector<1x1x16xf32>
    %15 = vector.shape_cast %14 : vector<1x1x16xf32> to vector<1x16xf32>
    %16 = vector.shape_cast %12 : vector<1x16xf32> to vector<1x1x16xf32>
    tpu.vector_store %arg5[%13, %c0_6, %c0_7], %16 {strides = array<i32>} : memref<1x1x16xf32, #tpu.memory_space<vmem>>, vector<1x1x16xf32>,
    %c1_i32_8 = arith.constant 1 : i32
    return
  }
  func.func @transform_0(%arg0: i32, %arg1: i32) -> (i32, i32, i32) {
    %c0_i32 = arith.constant 0 : i32
    %c0_i32_0 = arith.constant 0 : i32
    %c0_i32_1 = arith.constant 0 : i32
    return %arg0, %c0_i32, %c0_i32_0 : i32, i32, i32
  }
  func.func @transform_1(%arg0: i32, %arg1: i32) -> (i32, i32, i32) {
    %c0_i32 = arith.constant 0 : i32
    %c0_i32_0 = arith.constant 0 : i32
    return %arg0, %arg1, %c0_i32 : i32, i32, i32
  }
  func.func @transform_2(%arg0: i32, %arg1: i32) -> (i32, i32, i32) {
    %c0_i32 = arith.constant 0 : i32
    %c0_i32_0 = arith.constant 0 : i32
    return %arg0, %c0_i32, %arg1 : i32, i32, i32
  }
  func.func @transform_3(%arg0: i32, %arg1: i32) -> (i32, i32, i32) {
    %c0_i32 = arith.constant 0 : i32
    %c0_i32_0 = arith.constant 0 : i32
    return %arg0, %c0_i32, %arg1 : i32, i32, i32
  }
}

</mosaic_0001>

<bundles_post_ra>
// kernel: tpu_custom_call.1
= control target key start
LH: loop header
LB: loop body
LE: loop exit
PB: predicated region body
PF: predicated region fallthrough
CT: control target
= control target key end

     0   :  { %s978_s0 = inlined_call_operand.hbm [shape: f32[2,1,32], index: 0, kind: input, shape index: {}]   ;;  %s979_s1 = inlined_call_operand.hbm [shape: f32[4,16,32], index: 1, kind: input, shape index: {}]   ;;  %s980_s2 = inlined_call_operand.hbm [shape: f32[4,1,16], index: 2, kind: input, shape index: {}]   ;;  %s981_s3 = inlined_call_operand.hbm [shape: f32[2,1,16], index: 3, kind: output, shape index: {}]  }
   0x1   :  { %982 = sst [smem:[#allocation12_spill]] %s978_s0 }
   0x2   :  { %983 = sst [smem:[#allocation13_spill]] %s979_s1 }
   0x3   :  { %8 = vsyncpa [#allocation3], 0 }
   0x4   :  { %10 = vsyncpa [#allocation3 + $0x1], 0 }
   0x5   :  { %11 = vsyncpa [#allocation6], 0 }
   0x6   :  { %13 = vsyncpa [#allocation6 + $0x1], 0 }
   0x7   :  { %14 = vsyncpa [#allocation4], 0 }
   0x8   :  { %16 = vsyncpa [#allocation4 + $0x1], 0  ;;  %s793_s12 = smov 0   ;;  %s795_s13 = smov 0  }
   0x9   :  { %s797_s14 = smov 0   ;;  %s799_s15 = smov 0  }
   0xa   :  { %s801_s16 = smov 0   ;;  %s803_s17 = smov 0  }
   0xb LB: > { %s824_s18 = sadd.s32 4294967295, %s763_s17   ;;  %s492_s19 = sadd.s32 4294967294, %s763_s17   ;;  %s763_s17 = sphi %s803_s17, %s22_s17   ;;  %s759_s16 = sphi %s801_s16, %s996_s16   ;;  %s755_s15 = sphi %s799_s15, %s995_s15   ;;  %s751_s14 = sphi %s797_s14, %s994_s14   ;;  %s747_s13 = sphi %s795_s13, %s993_s13   ;;  %s743_s12 = sphi %s793_s12, %s992_s12  }
   0xc   : > { %s34_s20 = sadd.s32 1, %s759_s16  ;;  %s41_s21 = sadd.s32 1, %s751_s14 }
   0xd   : > { %p36_p0 = scmp.ge.s32.totalorder %s34_s20, 2  ;;  %p48_p1 = scmp.ne.s32.totalorder %s751_s14, %s747_s13 }
   0xe   : > { %p49_p2 = scmp.eq.s32.totalorder %s763_s17, 0  ;;  %p54_p3 = scmp.ne.s32.totalorder %s747_s13, %s743_s12 }
   0xf   : > { %s998_s20 = smov (%p36_p0, %s34_s20), 0  ;;  %p55_p5 = scmp.eq.s32.totalorder %s824_s18, 0 }
  0x10   : > { %p836_p4 = por %p49_p2, %p48_p1  ;;  %s38_s23 = ssub.s32 %s759_s16, %s998_s20 }
  0x11   : > { %p136_p6 = scmp.eq.s32.totalorder %s824_s18, 1  ;;  %p39_p7 = scmp.eq.s32.totalorder %s38_s23, 0 }
  0x12   : > { %p844_p8 = por %p55_p5, %p54_p3  ;;  %p142_p10 = scmp.eq.s32.totalorder %s492_s19, 1 }
  0x13   : > { %p848_p9 = por %p136_p6, %p48_p1  ;;  %p494_p12 = scmp.ge.s32.totalorder %s763_s17, 2 }
  0x14   : > { %s853_s26 = scalar_select %p39_p7, %s751_s14, %s41_s21  }
  0x15   : > { %p855_p11 = por %p142_p10, %p54_p3  ;;  %p541_p13 = scmp.lt.s32.totalorder %s763_s17, 2 }
  0x16   : > { %s862_s28 = sand.u32 1, %s751_s14   ;;  %s179_s29 = sand.u32 1, %s763_s17  }
  0x17   : > { %s496_s30 = sshll.u32 %s862_s28, 4  ;;  %p868_p0 = pnand %p541_p13, %p836_p4 }
  0x18   : > { %s508_s5 = sshll.u32 %s759_s16, 8  ;;  %s989_s1 = sld [smem:[#allocation13_spill]] }
  0x19   : > { %s183_s9 = scalar_lea.vmem [#allocation5], %s496_s30  ;;  %s876_s11 = scalar_lea.sflag [#allocation6], %s179_s29 }
  0x1a   : > { %s192_s10 = sshll.u32 %s183_s9, 4  ;;  %p597_p1 = pneg %p868_p0  ;;  %s193_s10 = int_to_ptr.vmem [resolvable:$true] %s192_s10 }
  0x1b   : > { %s608_s19 = scalar_lea.vmem %s193_s10, 256  ;;  %s765_s21 = smov [#allocation5]  }
  0x1c   : > { %p609_p2 = scmp.ne.s32.totalorder %s193_s10, %s608_s19  ;;  %s613_s22 = sshll.u32 %s765_s21, 4  ;;  %s614_s22 = int_to_ptr.vmem [resolvable:$false] %s613_s22 }
  0x1d   : > { %s615_s23 = scalar_lea.vmem %s614_s22, 512  ;;  %p616_p5 = scmp.lt.s32.totalorder %s193_s10, %s614_s22 }
  0x1e   : > { %s191_s8 = scalar_lea.hbm %s989_s1, %s508_s5  ;;  %p611_p3 = pnand %p609_p2, %p597_p1 }
  0x1f   : > { %p617_p6 = scmp.lt.s32.totalorder %s615_s23, %s608_s19 }
  0x20   : > { %p612_p4 = pneg %p611_p3 }
  0x21   : > { %p618_p7 = por %p617_p6, %p616_p5 }
  0x23   : > { %p619_p10 = pnand %p618_p7, %p612_p4 }
  0x25   : > { %622 = shalt.err (!%p619_p10)
}
  0x26   : > { %s766_s30 = smov 128   ;;  %s767_s29 = smov 8  }
  0x27   : > { %533 = dma.hbm_to_vmem [thread:$0]  (!%p868_p0), %s191_s8, 256, %s193_s10, %s876_s11, %s766_s30, %s766_s30, %s767_s29  }
  0x28   : > { %p500_p13 = scmp.ge.s32.totalorder %s763_s17, 1  ;;  %p218_p2 = scmp.lt.s32.totalorder %s763_s17, 3 }
  0x29   : > { %s495_s6 = sshll.u32 %s759_s16, 4  ;;  %s991_s0 = sld [smem:[#allocation12_spill]] }
  0x2a   : > { %p888_p3 = pnand %p500_p13, %p218_p2  ;;  %s165_s21 = scalar_lea.vmem [#allocation2], %s862_s28 }
  0x2b   : > { %s172_s22 = sshll.u32 %s165_s21, 4  ;;  %s163_s23 = scalar_lea.sflag [#allocation3], %s862_s28  ;;  %s173_s22 = int_to_ptr.vmem [resolvable:$true] %s172_s22 }
  0x2c   : > { %s636_s1 = scalar_lea.vmem %s173_s22, 16  ;;  %s768_s8 = smov [#allocation2]  }
  0x2d   : > { %p637_p4 = scmp.ne.s32.totalorder %s173_s22, %s636_s1  ;;  %s641_s10 = sshll.u32 %s768_s8, 4  ;;  %s642_s10 = int_to_ptr.vmem [resolvable:$false] %s641_s10 }
  0x2e   : > { %s643_s30 = scalar_lea.vmem %s642_s10, 32  ;;  %p644_p7 = scmp.lt.s32.totalorder %s173_s22, %s642_s10 }
  0x2f   : > { %s170_s19 = scalar_lea.hbm %s991_s0, %s495_s6  ;;  %p639_p5 = pnand %p637_p4, %p597_p1 }
  0x30   : > { %p645_p10 = scmp.lt.s32.totalorder %s643_s30, %s636_s1 }
  0x31   : > { %p640_p6 = pneg %p639_p5 }
  0x32   : > { %p646_p13 = por %p645_p10, %p644_p7 }
  0x34   : > { %p647_p2 = pnand %p646_p13, %p640_p6 }
  0x36   : > { %650 = shalt.err (!%p647_p2)
}
  0x37   : > { %530 = dma.hbm_to_vmem [thread:$0]  (!%p868_p0), %s170_s19, 16, %s173_s22, %s163_s23  }
  0x38   : > { %s211_s9 = scalar_lea.hbm %s980_s2, %s495_s6  ;;  %s205_s21 = scalar_lea.vmem [#allocation7], %s862_s28 }
  0x39   : > { %s213_s0 = sshll.u32 %s205_s21, 4  ;;  %s769_s1 = smov [#allocation7]   ;;  %s214_s0 = int_to_ptr.vmem [resolvable:$true] %s213_s0 }
  0x3a   : > { %s664_s8 = scalar_lea.vmem %s214_s0, 16  ;;  %s669_s10 = sshll.u32 %s769_s1, 4  ;;  %s670_s10 = int_to_ptr.vmem [resolvable:$false] %s669_s10 }
  0x3b   : > { %p665_p4 = scmp.ne.s32.totalorder %s214_s0, %s664_s8  ;;  %s671_s30 = scalar_lea.vmem %s670_s10, 32 }
  0x3c   : > { %p672_p6 = scmp.lt.s32.totalorder %s214_s0, %s670_s10  ;;  %p673_p10 = scmp.lt.s32.totalorder %s671_s30, %s664_s8 }
  0x3d   : > { %p667_p5 = pnand %p665_p4, %p597_p1 }
  0x3e   : > { %p674_p13 = por %p673_p10, %p672_p6 }
  0x3f   : > { %p668_p7 = pneg %p667_p5 }
  0x41   : > { %p675_p2 = pnand %p674_p13, %p668_p7 }
  0x43   : > { %678 = shalt.err (!%p675_p2)
}
  0x44   : > { %536 = dma.hbm_to_vmem [thread:$0]  (!%p868_p0), %s211_s9, 16, %s214_s0, %s876_s11  }
  0x45   : > { %222 = sbr.rel (%p888_p3) target bundleno = 295 (0x127), region = 32  ;;  %s916_s28 = sand.u32 (!%p888_p3), 1, %s747_s13  }
  0x46   : > { %s225_s6 = scalar_lea.sflag (!%p888_p3), [#allocation3], %s916_s28  ;;  %s227_s19 = scalar_lea.vmem (!%p888_p3), [#allocation2], %s916_s28 }
  0x4a   : > { %730 = dma.done.wait (%p844_p8), %s225_s6, 16  }
  0x4b   : > { %732 = vsyncadd (%p844_p8), %s225_s6, 4294967280  ;;  %s232_s0 = sand.u32 1, %s824_s18   ;;  %s501_s4 = sshll.u32 %s916_s28, 4 }
  0x4c   : > { %s233_s11 = scalar_lea.sflag [#allocation6], %s232_s0  ;;  %s236_s5 = scalar_lea.vmem [#allocation5], %s501_s4 }
  0x4d   : > { %734 = dma.done.wait (%p844_p8), %s233_s11, 272  }
  0x4e   : > { %736 = vsyncadd (%p844_p8), %s233_s11, 4294967024  ;;  %v770_v0 = vmov 0.0   ;;  %vm771_vm0 = vmmov 0   ;;  %vm279_vm1 = vcmask 261120   ;;  %v277_v1 = vld [vmem:[%s236_s5 + $0x8] sm:$0xff]  ;;  %v276_v2 = vld [vmem:[%s236_s5] sm:$0xff] }
  0x4f   : > { %512 = vmatprep.subr.mxu0 %v770_v0  ;;  %516 = vmatprep.mubr.msk.f32.mxu0 %vm771_vm0, %v770_v0  ;;  %v275_v3 = vld [vmem:[%s227_s19] sm:$0x1]  ;;  %s244_s18 = scalar_lea.vmem [#allocation7], %s916_s28  ;;  %s505_s24 = sshll.u32 %s755_s15, 4  ;;  %vm359_vm2 = vcmask 122880  }
  0x50   : > { %513 = vmatpush3.xpose.msk.msra.mxu0 %vm279_vm1, %v277_v1  ;;  %v278_v4 = vld [vmem:[%s244_s18] sm:$0x1]  ;;  %s273_s22 = scalar_lea.vmem [#allocation8], %s916_s28  ;;  %s936_s9 = scalar_lea.hbm %s981_s3, %s505_s24 }
  0x51   : > { %514 = vmatprep.subr.mxu0 %v770_v0  ;;  %s375_s23 = sshll.u32 %s273_s22, 4  ;;  %s362_s21 = scalar_lea.sflag [#allocation4], %s916_s28  ;;  %s376_s23 = int_to_ptr.vmem [resolvable:$true] %s375_s23 }
  0x52   : > { %s679_s8 = scalar_lea.vmem %s376_s23, 16  ;;  %s772_s15 = smov [#allocation8]  }
  0x53   : > { %p680_p8 = scmp.ne.s32.totalorder %s376_s23, %s679_s8  ;;  %s683_s1 = sshll.u32 %s772_s15, 4  ;;  %s684_s1 = int_to_ptr.vmem [resolvable:$false] %s683_s1 }
  0x54   : > { %515 = vmatpush3.xpose.msk.msra.mxu0 %vm279_vm1, %v276_v2  ;;  %s685_s10 = scalar_lea.vmem %s684_s1, 32  ;;  %p686_p3 = scmp.lt.s32.totalorder %s376_s23, %s684_s1 }
  0x55   : > { %p681_p0 = pnand %p680_p8, %p848_p9  ;;  %p687_p4 = scmp.lt.s32.totalorder %s685_s10, %s679_s8 }
  0x57   : > { %517 = vmatmul.mubr.msk.f32.vlgmr.msra.gmra.mxu0 %vm279_vm1, %v275_v3  ;;  %p682_p1 = pneg %p681_p0  ;;  %p688_p5 = por %p687_p4, %p686_p3 }
  0x59   : > { %p689_p7 = pnand %p688_p5, %p682_p1 }
 0x117   : > { %v355_v5 = vpop.f32.mrf.mxu0 }
 0x118   : > { %v356_v6 = vadd.f32 %v355_v5, %v278_v4 }
 0x119   : > { %v518_v7 = vpop.f32.mrf.mxu0 }
 0x11a   : > { %360 = vst.msk [vmem:[%s273_s22] sm:$0x1] %vm359_vm2, %v356_v6 }
 0x11b   : > { %692 = shalt.err (!%p689_p7)
}
 0x11c   : > { %s693_s30 = scalar_lea.hbm %s936_s9, 16  ;;  %s697_s19 = scalar_lea.hbm %s981_s3, 32 }
 0x11d   : > { %p694_p6 = scmp.ne.s32.totalorder %s936_s9, %s693_s30  ;;  %p698_p2 = scmp.lt.s32.totalorder %s936_s9, %s981_s3 }
 0x11e   : > { %p699_p8 = scmp.lt.s32.totalorder %s697_s19, %s693_s30 }
 0x11f   : > { %p695_p10 = pnand %p694_p6, %p848_p9 }
 0x120   : > { %p700_p0 = por %p699_p8, %p698_p2 }
 0x121   : > { %p696_p13 = pneg %p695_p10 }
 0x123   : > { %p701_p1 = pnand %p700_p0, %p696_p13 }
 0x125   : > { %704 = shalt.err (!%p701_p1)
}
 0x126   : > { %525 = dma.vmem_to_hbm [thread:$0]  (%p848_p9), %s376_s23, 16, %s936_s9, %s362_s21  }
 0x127 PF: > { %s387_s11 = sand.u32 1, %s743_s12   ;;  %p538_p3 = pnand %p494_p12, %p855_p11 }
 0x128   : > { %s388_s5 = scalar_lea.sflag [#allocation4], %s387_s11 }
 0x129   : > { %p539_p4 = pneg %p538_p3 }
 0x12b   : > { %738 = dma.done.wait (%p539_p4), %s388_s5, 16  }
 0x12c   : > { %740 = vsyncadd (%p539_p4), %s388_s5, 4294967280  ;;  %s22_s17 = sadd.s32 1, %s763_s17   ;;  %s992_s12 = smov %s747_s13 }
 0x12d   : > { %p19_p5 = scmp.ge.s32.totalorder %s22_s17, 4   ;;  %s993_s13 = smov %s751_s14 }
 0x12e   : > { %s994_s14 = smov %s853_s26  ;;  %s995_s15 = smov %s759_s16 }
 0x12f   : > { %s996_s16 = smov %s998_s20  ;;  %21 = sbr.rel (!%p19_p5) target bundleno = 11 (0xb), region = 101 }
 0x134   :  { %392 = vsyncpa [#allocation3], 1 }
 0x135   :  { %394 = vsyncpa [#allocation3 + $0x1], 1 }
 0x136   :  { %395 = vsyncpa [#allocation6], 1 }
 0x137   :  { %397 = vsyncpa [#allocation6 + $0x1], 1 }
 0x138   :  { %398 = vsyncpa [#allocation4], 1 }
 0x139   :  { %400 = vsyncpa [#allocation4 + $0x1], 1 }

</bundles_post_ra>
